<compile_context>
chip_gen: v7x
topology: tpu7x:2x2x1
jax: 0.10.0
libtpu: 0.0.40
codegen_flags: <defaults>
</compile_context>

<pallas_src>
import functools

import jax
import jax.numpy as jnp
import numpy as np
from jax import lax
from jax.experimental import pallas as pl
from jax.experimental.pallas import tpu as pltpu

BN_EPS = 1e-5


def _sigmoid_eup(x):
    # Exact identity sigmoid(x) = 0.5*tanh(0.5x)+0.5; tanh runs on the EUP
    # (separate VLIW slot) so this avoids f32 VALU divides.
    return 0.5 * jnp.tanh(0.5 * x) + 0.5


def _lstm_tail(gates, c_prev, hd):
    """Full-width activations (EUP) + iota lane-mask blend, then the cell update.
    PyTorch LSTMCell gate order is i | f | g | o."""
    sig_all = _sigmoid_eup(gates)
    tanh_all = jnp.tanh(gates)
    lane = lax.broadcasted_iota(jnp.int32, gates.shape, 1)
    is_g = (lane >= 2 * hd) & (lane < 3 * hd)
    act = jnp.where(is_g, tanh_all, sig_all)

    i_g = act[:, 0 * hd:1 * hd]
    f_g = act[:, 1 * hd:2 * hd]
    g_g = act[:, 2 * hd:3 * hd]
    o_g = act[:, 3 * hd:4 * hd]

    if c_prev is None:
        c_new = i_g * g_g                       # c_prev == 0
    else:
        c_new = f_g * c_prev + i_g * g_g
    h_new = o_g * jnp.tanh(c_new)
    return h_new, c_new


# --------------- pass 1: global BatchNorm stats -> folded scale/shift ----------------
def bn_scale_shift_kernel(patches_ref, wconv_ref, gamma_ref, beta_ref,
                          scale_ref, shift_ref, *, inv_n):
    i = pl.program_id(0)

    @pl.when(i == 0)
    def _init():
        scale_ref[...] = jnp.zeros_like(scale_ref)   # holds running sum
        shift_ref[...] = jnp.zeros_like(shift_ref)   # holds running sum of squares

    conv = jnp.dot(patches_ref[...], wconv_ref[...],
                   preferred_element_type=jnp.float32)          # (TB, Cout), f32 acc
    scale_ref[...] += jnp.sum(conv, axis=0, keepdims=True)
    shift_ref[...] += jnp.sum(conv * conv, axis=0, keepdims=True)

    @pl.when(i == pl.num_programs(0) - 1)
    def _finalize():
        mean = scale_ref[...] * inv_n
        var = shift_ref[...] * inv_n - mean * mean              # E[x^2] - mean^2
        rstd = lax.rsqrt(var + BN_EPS)
        sc = gamma_ref[...] * rstd
        scale_ref[...] = sc
        shift_ref[...] = beta_ref[...] - mean * sc


# ----------------- pass 2: conv -> BN -> ReLU -> fused LSTM cell ----------------
def conv_lstm_kernel(patches_ref, wconv_ref, scale_ref, shift_ref,
                     wlstm_ref, blstm_ref, hcprev_ref, hc_out_ref, *, hd):
    # Conv2d as im2col matmul (bf16 operands, f32 accumulate). Conv bias omitted:
    # a per-channel constant cancels exactly in batch-stat BatchNorm.
    conv = jnp.dot(patches_ref[...], wconv_ref[...],
                   preferred_element_type=jnp.float32)          # (TB, Cout)
    xr = jnp.maximum(conv * scale_ref[...] + shift_ref[...], 0.0)

    hc_prev = hcprev_ref[...]                                   # lane-fused [h | c]
    h_prev = hc_prev[:, :hd]
    c_prev = hc_prev[:, hd:]

    # Fused LSTM gates: [xr, h_prev] @ [W_ih^T; W_hh^T] + (b_ih + b_hh)
    xin = jnp.concatenate([xr, h_prev], axis=-1).astype(jnp.bfloat16)
    gates = jnp.dot(xin, wlstm_ref[...],
                    preferred_element_type=jnp.float32) + blstm_ref[...]  # (TB, 4*hd)

    h_new, c_new = _lstm_tail(gates, c_prev, hd)
    # Lane-fused [h | c] output -> one (TB, 2*hd) store.
    hc_out_ref[...] = jnp.concatenate([h_new, c_new], axis=-1)


def conv_lstm_kernel_nostate(patches_ref, wconv_ref, scale_ref, shift_ref,
                             wih_ref, blstm_ref, hc_out_ref, *, hd):
    # Specialized hc_prev=None path: h_prev = c_prev = 0, so the gate matmul only
    # contracts over xr (K = hd) and the forget-gate term is dropped.
    conv = jnp.dot(patches_ref[...], wconv_ref[...],
                   preferred_element_type=jnp.float32)          # (TB, Cout)
    xr = jnp.maximum(conv * scale_ref[...] + shift_ref[...], 0.0)

    gates = jnp.dot(xr.astype(jnp.bfloat16), wih_ref[...],
                    preferred_element_type=jnp.float32) + blstm_ref[...]  # (TB, 4*hd)

    h_new, c_new = _lstm_tail(gates, None, hd)
    hc_out_ref[...] = jnp.concatenate([h_new, c_new], axis=-1)


# --------------------------------- wrapper --------------------------------------
def im2col(x, kh=3, kw=3, stride=2, pad=1):
    """(N,C,H,W) -> (N*Ho*Wo, C*kh*kw), patch channel order = (C, kh, kw)."""
    N, C, H, W = x.shape
    Ho = (H + 2 * pad - kh) // stride + 1
    Wo = (W + 2 * pad - kw) // stride + 1
    xp = jnp.pad(x, ((0, 0), (0, 0), (pad, pad), (pad, pad)))
    cols = []
    for i in range(kh):
        for j in range(kw):
            cols.append(xp[:, :, i:i + stride * Ho:stride, j:j + stride * Wo:stride])
    p = jnp.stack(cols, axis=0).reshape(kh, kw, N, C, Ho, Wo)
    p = p.transpose(2, 4, 5, 3, 0, 1).reshape(N * Ho * Wo, C * kh * kw)
    return p, Ho, Wo


def _pick_row_tile(B):
    for tb in (1024, 512, 256, 128, 64, 32, 16, 8):
        if B % tb == 0:
            return tb
    return B


def conv_rnn_block(x, params, hc_prev=None):
    """Forward pass matching ConvRNNBlock.forward. Returns (y_NCHW, (h, c))."""
    N, Cin, H, W = x.shape
    wconv = params["conv_w"]                      # (Cout, Cin, 3, 3)
    Cout = wconv.shape[0]

    patches, Ho, Wo = im2col(x)                   # (B, Cin*9), f32
    B = N * Ho * Wo
    Kp = patches.shape[1]
    TB = _pick_row_tile(B)
    nb = B // TB

    # MXU operands in bf16 (f32 accumulation inside the kernels).
    patches_bf = patches.astype(jnp.bfloat16)
    wconv2d = wconv.reshape(Cout, -1).T.astype(jnp.bfloat16)            # (Kp, Cout)
    gamma = params["bn_gamma"].reshape(1, Cout).astype(jnp.float32)
    beta = params["bn_beta"].reshape(1, Cout).astype(jnp.float32)
    b_lstm = (params["b_ih"] + params["b_hh"]).reshape(1, 4 * Cout).astype(jnp.float32)

    tiled = lambda i: (i, 0)
    resident = lambda i: (0, 0)
    vmem_limit = 32 * 1024 * 1024   # safe on v5e/v6e (128 MiB) and v7x (64 MiB phys)

    # ---- pass 1: global BN stats -> folded scale/shift (reduction grid) ----
    scale, shift = pl.pallas_call(
        functools.partial(bn_scale_shift_kernel, inv_n=1.0 / B),
        grid=(nb,),
        in_specs=[pl.BlockSpec((TB, Kp), tiled),
                  pl.BlockSpec((Kp, Cout), resident),
                  pl.BlockSpec((1, Cout), resident),
                  pl.BlockSpec((1, Cout), resident)],
        out_specs=(pl.BlockSpec((1, Cout), resident),
                   pl.BlockSpec((1, Cout), resident)),
        out_shape=(jax.ShapeDtypeStruct((1, Cout), jnp.float32),
                   jax.ShapeDtypeStruct((1, Cout), jnp.float32)),
        compiler_params=pltpu.CompilerParams(
            dimension_semantics=("arbitrary",),
            vmem_limit_bytes=vmem_limit),
        cost_estimate=pl.CostEstimate(
            flops=2 * B * Kp * Cout + 3 * B * Cout,
            transcendentals=Cout,
            bytes_accessed=B * Kp * 2 + Kp * Cout * 2 + 4 * Cout * 4),
    )(patches_bf, wconv2d, gamma, beta)

    # ---- pass 2: conv -> BN -> ReLU -> fused LSTM cell, tiled over B ----
    if hc_prev is None:
        # Specialized zero-state kernel: only W_ih, no hc_prev input.
        w_lstm = params["w_ih"].T.astype(jnp.bfloat16)                  # (C, 4C)
        kernel = functools.partial(conv_lstm_kernel_nostate, hd=Cout)
        k_lstm = Cout
        extra_specs = []
        extra_args = []
        hc_bytes_in = 0
    else:
        h_prev, c_prev = hc_prev
        hc_in = jnp.concatenate(
            [h_prev.astype(jnp.float32), c_prev.astype(jnp.float32)], axis=-1)
        # Fused LSTM weight: gates = [xr, h] @ [W_ih^T; W_hh^T] + (b_ih + b_hh)
        w_lstm = jnp.concatenate([params["w_ih"].T, params["w_hh"].T],
                                 axis=0).astype(jnp.bfloat16)           # (2C, 4C)
        kernel = functools.partial(conv_lstm_kernel, hd=Cout)
        k_lstm = 2 * Cout
        extra_specs = [pl.BlockSpec((TB, 2 * Cout), tiled)]             # fused [h | c]
        extra_args = [hc_in]
        hc_bytes_in = B * 2 * Cout * 4

    hc = pl.pallas_call(
        kernel,
        grid=(nb,),
        in_specs=[pl.BlockSpec((TB, Kp), tiled),             # patches (bf16)
                  pl.BlockSpec((Kp, Cout), resident),        # conv weight (bf16)
                  pl.BlockSpec((1, Cout), resident),         # BN scale (gamma*rstd)
                  pl.BlockSpec((1, Cout), resident),         # BN shift (beta-mean*scale)
                  pl.BlockSpec((k_lstm, 4 * Cout), resident),  # LSTM weight (bf16)
                  pl.BlockSpec((1, 4 * Cout), resident),     # fused LSTM bias
                  *extra_specs],
        out_specs=pl.BlockSpec((TB, 2 * Cout), tiled),       # fused [h | c]
        out_shape=jax.ShapeDtypeStruct((B, 2 * Cout), jnp.float32),
        compiler_params=pltpu.CompilerParams(
            dimension_semantics=("parallel",),   # independent B tiles; 2-TC split on v7x
            vmem_limit_bytes=vmem_limit),
        cost_estimate=pl.CostEstimate(
            flops=2 * B * Kp * Cout + 2 * B * k_lstm * (4 * Cout) + 10 * B * Cout,
            transcendentals=B * 9 * Cout,
            bytes_accessed=(B * Kp * 2
                            + (Kp * Cout + k_lstm * 4 * Cout) * 2
                            + (2 * Cout + 4 * Cout) * 4
                            + hc_bytes_in
                            + B * 2 * Cout * 4)),
    )(patches_bf, wconv2d, scale, shift, w_lstm, b_lstm, *extra_args)

    h_new = hc[:, :Cout]
    c_new = hc[:, Cout:]
    # Module returns NCHW; a consumer accepting NHWC could skip this transpose.
    y = h_new.reshape(N, Ho, Wo, Cout).transpose(0, 3, 1, 2)
    return y, (h_new, c_new)


# ------------------------------- pure-JAX reference ------------------------------
def reference(x, params, hc_prev=None):
    """Pure-JAX f32 reference mirroring the PyTorch forward."""
    wconv, bconv = params["conv_w"], params["conv_b"]
    Cout = wconv.shape[0]
    conv = lax.conv_general_dilated(
        x, wconv, window_strides=(2, 2), padding=((1, 1), (1, 1)),
        dimension_numbers=("NCHW", "OIHW", "NCHW")) + bconv[None, :, None, None]
    mean = conv.mean(axis=(0, 2, 3), keepdims=True)
    var = conv.var(axis=(0, 2, 3), keepdims=True)   # biased, as BN training mode
    xbn = ((conv - mean) / jnp.sqrt(var + BN_EPS)
           * params["bn_gamma"][None, :, None, None]
           + params["bn_beta"][None, :, None, None])
    xr = jnp.maximum(xbn, 0.0)
    N, _, Ho, Wo = xr.shape
    flat = xr.transpose(0, 2, 3, 1).reshape(-1, Cout)
    B = flat.shape[0]
    if hc_prev is None:
        h_prev = jnp.zeros((B, Cout), jnp.float32)
        c_prev = jnp.zeros((B, Cout), jnp.float32)
    else:
        h_prev, c_prev = hc_prev
    gates = (flat @ params["w_ih"].T + params["b_ih"]
             + h_prev @ params["w_hh"].T + params["b_hh"])
    i, f, g, o = jnp.split(gates, 4, axis=1)
    i, f, o = jax.nn.sigmoid(i), jax.nn.sigmoid(f), jax.nn.sigmoid(o)
    g = jnp.tanh(g)
    c_new = f * c_prev + i * g
    h_new = o * jnp.tanh(c_new)
    y = h_new.reshape(N, Ho, Wo, Cout).transpose(0, 3, 1, 2)
    return y, (h_new, c_new)


if __name__ == "__main__":
    key = jax.random.PRNGKey(0)
    N, Cin, H, W = 2, 4, 16, 16
    Cout = 32                                    # out_channels == LSTM hidden size

    ks = jax.random.split(key, 9)
    params = {
        "conv_w": 0.1 * jax.random.normal(ks[0], (Cout, Cin, 3, 3), jnp.float32),
        "conv_b": 0.1 * jax.random.normal(ks[1], (Cout,), jnp.float32),
        "bn_gamma": 1.0 + 0.1 * jax.random.normal(ks[2], (Cout,), jnp.float32),
        "bn_beta": 0.1 * jax.random.normal(ks[3], (Cout,), jnp.float32),
        "w_ih": 0.1 * jax.random.normal(ks[4], (4 * Cout, Cout), jnp.float32),
        "w_hh": 0.1 * jax.random.normal(ks[5], (4 * Cout, Cout), jnp.float32),
        "b_ih": 0.1 * jax.random.normal(ks[6], (4 * Cout,), jnp.float32),
        "b_hh": 0.1 * jax.random.normal(ks[7], (4 * Cout,), jnp.float32),
    }
    x = jax.random.normal(ks[8], (N, Cin, H, W), jnp.float32)

    # Step 1 (no previous state -> specialized zero-state kernel path).
    y, (h, c) = conv_rnn_block(x, params, hc_prev=None)
    jax.block_until_ready((y, h, c))

    y_ref, (h_ref, c_ref) = reference(x, params, hc_prev=None)
    # Tolerance reflects bf16 MXU operands (f32 accumulation) vs. the f32 reference.
    np.testing.assert_allclose(np.asarray(y), np.asarray(y_ref), atol=2e-2, rtol=2e-2)
    np.testing.assert_allclose(np.asarray(c), np.asarray(c_ref), atol=2e-2, rtol=2e-2)

    # Step 2 (exercise the hc_prev recurrent path with the fused-state kernel).
    y2, (h2, c2) = conv_rnn_block(x, params, hc_prev=(h, c))
    jax.block_until_ready((y2, h2, c2))
    y2_ref, (h2_ref, c2_ref) = reference(x, params, hc_prev=(h_ref, c_ref))
    np.testing.assert_allclose(np.asarray(y2), np.asarray(y2_ref), atol=3e-2, rtol=3e-2)
    np.testing.assert_allclose(np.asarray(c2), np.asarray(c2_ref), atol=3e-2, rtol=3e-2)

    print("KERNEL_OK")
</pallas_src>

<mosaic_0001>
module attributes {stable_mosaic.version = 11 : i64} {
  func.func @bn_scale_shift_kernel(%arg0: i32, %arg1: memref<128x36xbf16, #tpu.memory_space<vmem>>, %arg2: memref<36x32xbf16, #tpu.memory_space<vmem>>, %arg3: memref<1x32xf32, #tpu.memory_space<vmem>>, %arg4: memref<1x32xf32, #tpu.memory_space<vmem>>, %arg5: memref<1x32xf32, #tpu.memory_space<vmem>>, %arg6: memref<1x32xf32, #tpu.memory_space<vmem>>) attributes {dimension_semantics = [#tpu.dimension_semantics<arbitrary>], iteration_bounds = array<i64: 1>, scalar_prefetch = 0 : i64, scratch_operands = 0 : i64, tpu.core_type = #tpu.core_type<tc>, window_params = [{transform_indices = @transform_0, window_bounds = array<i64: 128, 36>}, {pipeline_mode = #tpu.pipeline_mode<synchronous>, transform_indices = @transform_1, window_bounds = array<i64: 36, 32>}, {pipeline_mode = #tpu.pipeline_mode<synchronous>, transform_indices = @transform_2, window_bounds = array<i64: 1, 32>}, {pipeline_mode = #tpu.pipeline_mode<synchronous>, transform_indices = @transform_3, window_bounds = array<i64: 1, 32>}, {pipeline_mode = #tpu.pipeline_mode<synchronous>, transform_indices = @transform_4, window_bounds = array<i64: 1, 32>}, {pipeline_mode = #tpu.pipeline_mode<synchronous>, transform_indices = @transform_5, window_bounds = array<i64: 1, 32>}]} {
    %c0_i32 = arith.constant 0 : i32
    %0 = arith.cmpi eq, %arg0, %c0_i32 : i32
    %1 = arith.extui %0 : i1 to i32
    %c0_i32_0 = arith.constant 0 : i32
    %2 = arith.cmpi ne, %1, %c0_i32_0 : i32
    scf.if %2 {
      %cst_16 = arith.constant 0.000000e+00 : f32
      %20 = vector.broadcast %cst_16 : f32 to vector<1x32xf32>
      %c0_17 = arith.constant 0 : index
      %c0_18 = arith.constant 0 : index
      %21 = vector.load %arg5[%c0_17, %c0_18] : memref<1x32xf32, #tpu.memory_space<vmem>>, vector<1x32xf32>
      tpu.vector_store %arg5[%c0_17, %c0_18], %20 {strides = array<i32>} : memref<1x32xf32, #tpu.memory_space<vmem>>, vector<1x32xf32>,
      %cst_19 = arith.constant 0.000000e+00 : f32
      %22 = vector.broadcast %cst_19 : f32 to vector<1x32xf32>
      %c0_20 = arith.constant 0 : index
      %c0_21 = arith.constant 0 : index
      %23 = vector.load %arg6[%c0_20, %c0_21] : memref<1x32xf32, #tpu.memory_space<vmem>>, vector<1x32xf32>
      tpu.vector_store %arg6[%c0_20, %c0_21], %22 {strides = array<i32>} : memref<1x32xf32, #tpu.memory_space<vmem>>, vector<1x32xf32>,
    } else {
    }
    %c0 = arith.constant 0 : index
    %c0_1 = arith.constant 0 : index
    %3 = vector.load %arg1[%c0, %c0_1] : memref<128x36xbf16, #tpu.memory_space<vmem>>, vector<128x36xbf16>
    %c0_2 = arith.constant 0 : index
    %c0_3 = arith.constant 0 : index
    %4 = vector.load %arg2[%c0_2, %c0_3] : memref<36x32xbf16, #tpu.memory_space<vmem>>, vector<36x32xbf16>
    %cst = arith.constant dense<0.000000e+00> : vector<128x32xf32>
    %5 = tpu.matmul %3, %4, %cst {dimension_numbers = #tpu.dot_dimension_numbers<[1], [0], [0], [1], [0, 0, 1, 1], [], []>} : vector<128x36xbf16>, vector<36x32xbf16>, vector<128x32xf32> -> vector<128x32xf32>
    %c0_4 = arith.constant 0 : index
    %c0_5 = arith.constant 0 : index
    %6 = vector.load %arg5[%c0_4, %c0_5] : memref<1x32xf32, #tpu.memory_space<vmem>>, vector<1x32xf32>
    %cst_6 = arith.constant dense<0.000000e+00> : vector<32xf32>
    %7 = vector.multi_reduction <add>, %5, %cst_6 [0] : vector<128x32xf32> to vector<32xf32>
    %8 = vector.shape_cast %7 : vector<32xf32> to vector<1x32xf32>
    %9 = arith.addf %6, %8 : vector<1x32xf32>
    %c0_7 = arith.constant 0 : index
    %c0_8 = arith.constant 0 : index
    %10 = vector.load %arg5[%c0_7, %c0_8] : memref<1x32xf32, #tpu.memory_space<vmem>>, vector<1x32xf32>
    tpu.vector_store %arg5[%c0_7, %c0_8], %9 {strides = array<i32>} : memref<1x32xf32, #tpu.memory_space<vmem>>, vector<1x32xf32>,
    %c0_9 = arith.constant 0 : index
    %c0_10 = arith.constant 0 : index
    %11 = vector.load %arg6[%c0_9, %c0_10] : memref<1x32xf32, #tpu.memory_space<vmem>>, vector<1x32xf32>
    %12 = arith.mulf %5, %5 : vector<128x32xf32>
    %cst_11 = arith.constant dense<0.000000e+00> : vector<32xf32>
    %13 = vector.multi_reduction <add>, %12, %cst_11 [0] : vector<128x32xf32> to vector<32xf32>
    %14 = vector.shape_cast %13 : vector<32xf32> to vector<1x32xf32>
    %15 = arith.addf %11, %14 : vector<1x32xf32>
    %c0_12 = arith.constant 0 : index
    %c0_13 = arith.constant 0 : index
    %16 = vector.load %arg6[%c0_12, %c0_13] : memref<1x32xf32, #tpu.memory_space<vmem>>, vector<1x32xf32>
    tpu.vector_store %arg6[%c0_12, %c0_13], %15 {strides = array<i32>} : memref<1x32xf32, #tpu.memory_space<vmem>>, vector<1x32xf32>,
    %c0_i32_14 = arith.constant 0 : i32
    %17 = arith.cmpi eq, %arg0, %c0_i32_14 : i32
    %18 = arith.extui %17 : i1 to i32
    %c0_i32_15 = arith.constant 0 : i32
    %19 = arith.cmpi ne, %18, %c0_i32_15 : i32
    scf.if %19 {
      %c0_16 = arith.constant 0 : index
      %c0_17 = arith.constant 0 : index
      %20 = vector.load %arg5[%c0_16, %c0_17] : memref<1x32xf32, #tpu.memory_space<vmem>>, vector<1x32xf32>
      %cst_18 = arith.constant 7.812500e-03 : f32
      %21 = vector.broadcast %cst_18 : f32 to vector<1x32xf32>
      %22 = arith.mulf %20, %21 : vector<1x32xf32>
      %c0_19 = arith.constant 0 : index
      %c0_20 = arith.constant 0 : index
      %23 = vector.load %arg6[%c0_19, %c0_20] : memref<1x32xf32, #tpu.memory_space<vmem>>, vector<1x32xf32>
      %cst_21 = arith.constant 7.812500e-03 : f32
      %24 = vector.broadcast %cst_21 : f32 to vector<1x32xf32>
      %25 = arith.mulf %23, %24 : vector<1x32xf32>
      %26 = arith.mulf %22, %22 : vector<1x32xf32>
      %27 = arith.subf %25, %26 : vector<1x32xf32>
      %cst_22 = arith.constant 9.99999974E-6 : f32
      %28 = vector.broadcast %cst_22 : f32 to vector<1x32xf32>
      %29 = arith.addf %27, %28 : vector<1x32xf32>
      %30 = math.rsqrt %29 : vector<1x32xf32>
      %c0_23 = arith.constant 0 : index
      %c0_24 = arith.constant 0 : index
      %31 = vector.load %arg3[%c0_23, %c0_24] : memref<1x32xf32, #tpu.memory_space<vmem>>, vector<1x32xf32>
      %32 = arith.mulf %31, %30 : vector<1x32xf32>
      %c0_25 = arith.constant 0 : index
      %c0_26 = arith.constant 0 : index
      %33 = vector.load %arg5[%c0_25, %c0_26] : memref<1x32xf32, #tpu.memory_space<vmem>>, vector<1x32xf32>
      tpu.vector_store %arg5[%c0_25, %c0_26], %32 {strides = array<i32>} : memref<1x32xf32, #tpu.memory_space<vmem>>, vector<1x32xf32>,
      %c0_27 = arith.constant 0 : index
      %c0_28 = arith.constant 0 : index
      %34 = vector.load %arg4[%c0_27, %c0_28] : memref<1x32xf32, #tpu.memory_space<vmem>>, vector<1x32xf32>
      %35 = arith.mulf %22, %32 : vector<1x32xf32>
      %36 = arith.subf %34, %35 : vector<1x32xf32>
      %c0_29 = arith.constant 0 : index
      %c0_30 = arith.constant 0 : index
      %37 = vector.load %arg6[%c0_29, %c0_30] : memref<1x32xf32, #tpu.memory_space<vmem>>, vector<1x32xf32>
      tpu.vector_store %arg6[%c0_29, %c0_30], %36 {strides = array<i32>} : memref<1x32xf32, #tpu.memory_space<vmem>>, vector<1x32xf32>,
    } else {
    }
    return
  }
  func.func @transform_0(%arg0: i32) -> (i32, i32) {
    %c0_i32 = arith.constant 0 : i32
    %c0_i32_0 = arith.constant 0 : i32
    return %arg0, %c0_i32 : i32, i32
  }
  func.func @transform_1(%arg0: i32) -> (i32, i32) {
    %c0_i32 = arith.constant 0 : i32
    %c0_i32_0 = arith.constant 0 : i32
    %c0_i32_1 = arith.constant 0 : i32
    return %c0_i32, %c0_i32_0 : i32, i32
  }
  func.func @transform_2(%arg0: i32) -> (i32, i32) {
    %c0_i32 = arith.constant 0 : i32
    %c0_i32_0 = arith.constant 0 : i32
    %c0_i32_1 = arith.constant 0 : i32
    return %c0_i32, %c0_i32_0 : i32, i32
  }
  func.func @transform_3(%arg0: i32) -> (i32, i32) {
    %c0_i32 = arith.constant 0 : i32
    %c0_i32_0 = arith.constant 0 : i32
    %c0_i32_1 = arith.constant 0 : i32
    return %c0_i32, %c0_i32_0 : i32, i32
  }
  func.func @transform_4(%arg0: i32) -> (i32, i32) {
    %c0_i32 = arith.constant 0 : i32
    %c0_i32_0 = arith.constant 0 : i32
    %c0_i32_1 = arith.constant 0 : i32
    return %c0_i32, %c0_i32_0 : i32, i32
  }
  func.func @transform_5(%arg0: i32) -> (i32, i32) {
    %c0_i32 = arith.constant 0 : i32
    %c0_i32_0 = arith.constant 0 : i32
    %c0_i32_1 = arith.constant 0 : i32
    return %c0_i32, %c0_i32_0 : i32, i32
  }
}

</mosaic_0001>

<bundles_post_ra>
// kernel: tpu_custom_call.1
= control target key start
LH: loop header
LB: loop body
LE: loop exit
PB: predicated region body
PF: predicated region fallthrough
CT: control target
= control target key end

     0   :  { %11 = vsyncpa [#allocation3], 0  ;;  %vm105_vm0 = vcmask 293888   ;;  %vm130_vm1 = vcmask 1041408   ;;  %s651_s0 = inlined_call_operand.vmem [shape: bf16[128,36], index: 0, kind: input, shape index: {}]   ;;  %s652_s1 = inlined_call_operand.vmem [shape: bf16[36,32], index: 1, kind: input, shape index: {}]   ;;  %s653_s2 = inlined_call_operand.vmem [shape: f32[1,32], index: 2, kind: input, shape index: {}]   ;;  %s654_s3 = inlined_call_operand.vmem [shape: f32[1,32], index: 3, kind: input, shape index: {}]   ;;  %s655_s4 = inlined_call_operand.hbm [shape: f32[1,32], index: 4, kind: output, shape index: {0}]   ;;  %s656_s5 = inlined_call_operand.hbm [shape: f32[1,32], index: 5, kind: output, shape index: {1}]  }
   0x1   :  { %v438_v0 = vld [vmem:[%s652_s1] sm:$0xff]   ;;  %v439_v1 = vld [vmem:[%s652_s1 + $0x8] sm:$0xff]   ;;  %v440_v2 = vld [vmem:[%s652_s1 + $0x10] ss:$0 sps:$4 sm:$0x33]  }
   0x2   :  { %405 = vmatprep.subr.bf16.mxu0 %v438_v0  ;;  %v441_v3 = vld [vmem:[%s651_s0] sm:$0xff]   ;;  %427 = vmatprep.subr.bf16.mxu1 %v438_v0  ;;  %v132_v5 = vsel %vm130_vm1, %v440_v2, 0  ;;  %v442_v6 = vld [vmem:[%s651_s0 + $0x8] sm:$0xff]  }
   0x3   :  { %406 = vmatpush3.bf16.msra.mxu0 %v438_v0  ;;  %430 = vmatpush3.bf16.msra.mxu1 %v438_v0  ;;  %v445_v4 = vld [vmem:[%s651_s0 + $0x20] sm:$0xff]   ;;  %v446_v7 = vld [vmem:[%s651_s0 + $0x28] sm:$0xff]  }
   0x4   :  { %407 = vmatprep.subr.bf16.mxu0 %v439_v1  ;;  %411 = vmatprep.mubr.msk.bf16.mxu0 %vm105_vm0, %v441_v3 }
   0x5   :  { %428 = vmatprep.subr.bf16.mxu1 %v439_v1  ;;  %419 = vmatprep.mubr.msk.bf16.mxu1 %vm105_vm0, %v445_v4 }
   0x7   :  { %408 = vmatpush3.bf16.msra.mxu0 %v439_v1  ;;  %431 = vmatpush3.bf16.msra.mxu1 %v439_v1 }
   0x8   :  { %433 = vmatprep.subr.msk.bf16.mxu0 %vm130_vm1, %v440_v2  ;;  %434 = vmatprep.subr.msk.bf16.mxu1 %vm130_vm1, %v440_v2 }
   0x9   :  { %12 = vsyncpa [#allocation5], 0  ;;  %v443_v8 = vld [vmem:[%s651_s0 + $0x10] sm:$0xff]   ;;  %v444_v10 = vld [vmem:[%s651_s0 + $0x18] sm:$0xff]   ;;  %vm26_vm2 = vcmask 253952   ;;  %v499_v12 = vmov 0.0  }
   0xa   :  { %v447_v9 = vld [vmem:[%s651_s0 + $0x30] sm:$0xff]   ;;  %v448_v11 = vld [vmem:[%s651_s0 + $0x38] sm:$0xff]   ;;  %27 = vst.msk [vmem:[#allocation2] sm:$0x1] %vm26_vm2, %v499_v12  ;;  %28 = vst.msk [vmem:[#allocation4] sm:$0x1] %vm26_vm2, %v499_v12 }
   0xb   :  { %410 = vmatpush3.bf16.msra.mxu0 %v132_v5  ;;  %432 = vmatpush3.bf16.msra.mxu1 %v132_v5  ;;  %vm232_vm3 = vcmask 261120   ;;  %s500_s15 = smov [#allocation2]   ;;  %s501_s19 = smov [#allocation4]  }
   0xc   :  { %s353_s16 = sshll.u32 %s500_s15, 4  ;;  %s363_s20 = sshll.u32 %s501_s19, 4  ;;  %s354_s16 = int_to_ptr.vmem [resolvable:$true] %s353_s16  ;;  %s364_s20 = int_to_ptr.vmem [resolvable:$true] %s363_s20 }
   0xd   :  { %s451_s21 = scalar_lea.vmem %s354_s16, 16  ;;  %s455_s22 = scalar_lea.vmem %s354_s16, 32 }
   0xe   :  { %412 = vmatmul.mubr.msk.bf16.vlgmr.msra.gmra.mrb[0].mxu0 %vm105_vm0, %v442_v6  ;;  %420 = vmatmul.mubr.msk.bf16.vlgmr.msra.gmra.mrb[0].mxu1 %vm105_vm0, %v446_v7  ;;  %p452_p0 = scmp.ne.s32.totalorder %s354_s16, %s451_s21  ;;  %p456_p1 = scmp.lt.s32.totalorder %s354_s16, %s354_s16 }
   0xf   :  { %415 = vmatprep.mubr.msk.bf16.mxu0 %vm105_vm0, %v443_v8  ;;  %423 = vmatprep.mubr.msk.bf16.mxu1 %vm105_vm0, %v447_v9  ;;  %p457_p2 = scmp.lt.s32.totalorder %s455_s22, %s451_s21 }
  0x11   :  { %p458_p3 = por %p457_p2, %p456_p1 }
  0x13   :  { %p459_p4 = pnand %p458_p3, %p452_p0 }
  0x16   :  { %416 = vmatmul.mubr.msk.bf16.gmra.mrb[4].mxu0 %vm105_vm0, %v444_v10  ;;  %424 = vmatmul.mubr.msk.bf16.gmra.mrb[4].mxu1 %vm105_vm0, %v448_v11 }
  0xe1   :  { %v413_v13 = vpop.f32.mrb[0].mxu0  ;;  %v575_v14 = vpop.f32.mrb[0].mxu1 }
  0xe2   :  { %v168_v15 = vpop.f32.mrb[1].mxu0  ;;  %v200_v16 = vpop.f32.mrb[1].mxu1  ;;  %v276_v22 = vmul.f32 %v413_v13, %v413_v13  ;;  %v236_v27 = vsel %vm232_vm3, %v413_v13, 0.0  ;;  %v284_v8 = vmul.f32 %v575_v14, %v575_v14  ;;  %v252_v12 = vsel %vm232_vm3, %v575_v14, 0.0 }
  0xe3   :  { %v274_v17 = vmul.f32 %v168_v15, %v168_v15  ;;  %v414_v18 = vpop.f32.mrb[2].mxu0  ;;  %v577_v19 = vpop.f32.mrb[2].mxu1  ;;  %v233_v23 = vsel %vm232_vm3, %v168_v15, 0.0  ;;  %v282_v59 = vmul.f32 %v200_v16, %v200_v16  ;;  %v248_v0 = vsel %vm232_vm3, %v200_v16, 0.0 }
  0xe4   :  { %v171_v20 = vpop.f32.mrb[3].mxu0  ;;  %v203_v21 = vpop.f32.mrb[3].mxu1  ;;  %v277_v29 = vmul.f32 %v414_v18, %v414_v18  ;;  %v293_v33 = vsel %vm232_vm3, %v276_v22, 0.0  ;;  %v238_v34 = vsel %vm232_vm3, %v414_v18, 0.0  ;;  %v285_v13 = vmul.f32 %v577_v19, %v577_v19 }
  0xe5   :  { %v234_v24 = vsel %vm232_vm3, %v171_v20, 0.0  ;;  %v275_v25 = vmul.f32 %v171_v20, %v171_v20  ;;  %v290_v28 = vsel %vm232_vm3, %v274_v17, 0.0  ;;  %v305_v4 = vsel %vm232_vm3, %v282_v59, 0.0 }
  0xe6   :  { %v235_v26 = vadd.f32 %v234_v24, %v233_v23  ;;  %v295_v41 = vsel %vm232_vm3, %v277_v29, 0.0  ;;  %v283_v5 = vmul.f32 %v203_v21, %v203_v21  ;;  %v250_v9 = vsel %vm232_vm3, %v203_v21, 0.0 }
  0xe7   :  { %v291_v30 = vsel %vm232_vm3, %v275_v25, 0.0  ;;  %v309_v20 = vsel %vm232_vm3, %v284_v8, 0.0  ;;  %v254_v22 = vsel %vm232_vm3, %v577_v19, 0.0  ;;  %v311_v25 = vsel %vm232_vm3, %v285_v13, 0.0 }
  0xe8   :  { %v237_v31 = vadd.f32 %v236_v27, %v235_v26  ;;  %v292_v32 = vadd.f32 %v291_v30, %v290_v28  ;;  %v307_v15 = vsel %vm232_vm3, %v283_v5, 0.0  ;;  %v343_v5 = vld [vmem:[%s654_s3] sm:$0x1] }
  0xe9   :  { %v417_v35 = vpop.f32.mrb[4].mxu0  ;;  %v425_v36 = vpop.f32.mrb[4].mxu1 }
  0xea   :  { %v294_v37 = vadd.f32 %v293_v33, %v292_v32  ;;  %v184_v38 = vpop.f32.mrb[5].mxu0  ;;  %v239_v39 = vadd.f32 %v238_v34, %v237_v31  ;;  %v216_v40 = vpop.f32.mrb[5].mxu1  ;;  %v280_v50 = vmul.f32 %v417_v35, %v417_v35  ;;  %v244_v56 = vsel %vm232_vm3, %v417_v35, 0.0 }
  0xeb   :  { %v240_v42 = vsel %vm232_vm3, %v184_v38, 0.0  ;;  %v278_v43 = vmul.f32 %v184_v38, %v184_v38  ;;  %v418_v44 = vpop.f32.mrb[6].mxu0  ;;  %v426_v45 = vpop.f32.mrb[6].mxu1  ;;  %v286_v16 = vmul.f32 %v216_v40, %v216_v40  ;;  %v256_v21 = vsel %vm232_vm3, %v216_v40, 0.0 }
  0xec   :  { %v241_v46 = vadd.f32 %v240_v42, %v239_v39  ;;  %v296_v47 = vadd.f32 %v295_v41, %v294_v37  ;;  %v187_v48 = vpop.f32.mrb[7].mxu0  ;;  %v219_v49 = vpop.f32.mrb[7].mxu1  ;;  %v281_v57 = vmul.f32 %v418_v44, %v418_v44  ;;  %v301_v62 = vsel %vm232_vm3, %v280_v50, 0.0 }
  0xed   :  { %v297_v51 = vsel %vm232_vm3, %v278_v43, 0.0  ;;  %v242_v52 = vsel %vm232_vm3, %v187_v48, 0.0  ;;  %v279_v53 = vmul.f32 %v187_v48, %v187_v48  ;;  %v246_v63 = vsel %vm232_vm3, %v418_v44, 0.0 }
  0xee   :  { %v298_v54 = vadd.f32 %v297_v51, %v296_v47  ;;  %v243_v55 = vadd.f32 %v242_v52, %v241_v46  ;;  %v303_v3 = vsel %vm232_vm3, %v281_v57, 0.0  ;;  %v313_v14 = vsel %vm232_vm3, %v286_v16, 0.0 }
  0xef   :  { %v299_v58 = vsel %vm232_vm3, %v279_v53, 0.0  ;;  %v287_v26 = vmul.f32 %v219_v49, %v219_v49  ;;  %v288_v29 = vmul.f32 %v425_v36, %v425_v36  ;;  %v258_v30 = vsel %vm232_vm3, %v219_v49, 0.0  ;;  %v231_v53 = vld [vmem:[#allocation2] sm:$0x1] }
  0xf0   :  { %v245_v60 = vadd.f32 %v244_v56, %v243_v55  ;;  %v300_v61 = vadd.f32 %v299_v58, %v298_v54  ;;  %v260_v33 = vsel %vm232_vm3, %v425_v36, 0.0  ;;  %v289_v34 = vmul.f32 %v426_v45, %v426_v45  ;;  %v273_v56 = vld [vmem:[#allocation4] sm:$0x1] }
  0xf1   :  { %v315_v19 = vsel %vm232_vm3, %v287_v26, 0.0  ;;  %v317_v38 = vsel %vm232_vm3, %v288_v29, 0.0  ;;  %v262_v39 = vsel %vm232_vm3, %v426_v45, 0.0 }
  0xf2   :  { %v302_v1 = vadd.f32 %v301_v62, %v300_v61  ;;  %v247_v2 = vadd.f32 %v246_v63, %v245_v60  ;;  %v319_v42 = vsel %vm232_vm3, %v289_v34, 0.0 }
  0xf4   :  { %v249_v6 = vadd.f32 %v248_v0, %v247_v2  ;;  %v304_v7 = vadd.f32 %v303_v3, %v302_v1  ;;  %v340_v2 = vld [vmem:[%s653_s2] sm:$0x1] }
  0xf6   :  { %v306_v10 = vadd.f32 %v305_v4, %v304_v7  ;;  %v251_v11 = vadd.f32 %v250_v9, %v249_v6 }
  0xf8   :  { %v253_v17 = vadd.f32 %v252_v12, %v251_v11  ;;  %v308_v18 = vadd.f32 %v307_v15, %v306_v10 }
  0xfa   :  { %v310_v23 = vadd.f32 %v309_v20, %v308_v18  ;;  %v255_v24 = vadd.f32 %v254_v22, %v253_v17 }
  0xfc   :  { %v257_v27 = vadd.f32 %v256_v21, %v255_v24  ;;  %v312_v28 = vadd.f32 %v311_v25, %v310_v23 }
  0xfe   :  { %v314_v31 = vadd.f32 %v313_v14, %v312_v28  ;;  %v259_v32 = vadd.f32 %v258_v30, %v257_v27 }
 0x100   :  { %v261_v35 = vadd.f32 %v260_v33, %v259_v32  ;;  %v316_v37 = vadd.f32 %v315_v19, %v314_v31 }
 0x102   :  { %v263_v40 = vadd.f32 %v262_v39, %v261_v35  ;;  %v318_v41 = vadd.f32 %v317_v38, %v316_v37 }
 0x104   :  { %v264_v43 = vrot.slane %v263_v40, 4  ;;  %v320_v44 = vadd.f32 %v319_v42, %v318_v41 }
 0x106   :  { %v265_v46 = vadd.f32 %v264_v43, %v263_v40  ;;  %v321_v47 = vrot.slane %v320_v44, 4 }
 0x108   :  { %v266_v48 = vrot.slane %v265_v46, 2  ;;  %v322_v49 = vadd.f32 %v321_v47, %v320_v44 }
 0x10a   :  { %v267_v36 = vadd.f32 %v266_v48, %v265_v46  ;;  %v323_v50 = vrot.slane %v322_v49, 2 }
 0x10c   :  { %v268_v51 = vrot.slane %v267_v36, 1  ;;  %v324_v52 = vadd.f32 %v323_v50, %v322_v49 }
 0x10e   :  { %v325_v54 = vrot.slane %v324_v52, 1  ;;  %v269_v55 = vadd.f32 %v268_v51, %v267_v36 }
 0x110   :  { %v326_v57 = vadd.f32 %v325_v54, %v324_v52  ;;  %v270_v45 = vadd.f32 %v269_v55, %v231_v53 }
 0x112   :  { %272 = vst.msk [vmem:[#allocation2] sm:$0x1] %vm26_vm2, %v270_v45  ;;  %v327_v58 = vadd.f32 %v326_v57, %v273_v56 }
 0x114   :  { %328 = vst.msk [vmem:[#allocation4] sm:$0x1] %vm26_vm2, %v327_v58 }
 0x119   :  { %v332_v59 = vld [vmem:[#allocation2] sm:$0x1] }
 0x11a   :  { %v333_v60 = vmul.f32 0.0078125, %v332_v59 }
 0x11b   :  { %v334_v61 = vld [vmem:[#allocation4] sm:$0x1] }
 0x11c   :  { %v335_v62 = vmul.f32 0.0078125, %v334_v61  ;;  %v336_v63 = vmul.f32 %v333_v60, %v333_v60 }
 0x11e   :  { %v337_v0 = vsub.f32 %v335_v62, %v336_v63 }
 0x120   :  { %v338_v1 = vadd.f32 1e-05, %v337_v0 }
 0x122   :  { %449 = vrsqrt.f32 %v338_v1 }
 0x12c   :  { %v450_v3 = vpop.eup %449 }
 0x12d   :  { %v341_v4 = vmul.f32 %v450_v3, %v340_v2 }
 0x12f   :  { %342 = vst.msk [vmem:[#allocation2] sm:$0x1] %vm26_vm2, %v341_v4  ;;  %v344_v6 = vmul.f32 %v341_v4, %v333_v60 }
 0x130   :  { %462 = shalt.err (!%p459_p4)
}
 0x131   :  { %s463_s24 = scalar_lea.hbm %s655_s4, 16 }
 0x132   :  { %p464_p5 = scmp.ne.s32.totalorder %s655_s4, %s463_s24  ;;  %p467_p6 = scmp.lt.u32.totalorder %s463_s24, %s655_s4 }
 0x134   :  { %p469_p7 = pnand %p467_p6, %p464_p5 }
 0x136   :  { %472 = shalt.err (!%p469_p7)
}
 0x137   :  { %356 = dma.vmem_to_hbm [thread:$0]  %s354_s16, 16, %s655_s4, [#allocation3]   ;;  %v345_v7 = vsub.f32 %v343_v5, %v344_v6 }
 0x138   :  { %s473_s29 = scalar_lea.vmem %s364_s20, 16  ;;  %s477_s30 = scalar_lea.vmem %s364_s20, 32 }
 0x139   :  { %346 = vst.msk [vmem:[#allocation4] sm:$0x1] %vm26_vm2, %v345_v7  ;;  %p474_p8 = scmp.ne.s32.totalorder %s364_s20, %s473_s29  ;;  %p478_p9 = scmp.lt.s32.totalorder %s364_s20, %s364_s20 }
 0x13a   :  { %p479_p10 = scmp.lt.s32.totalorder %s477_s30, %s473_s29 }
 0x13c   :  { %p480_p11 = por %p479_p10, %p478_p9 }
 0x13e   :  { %p481_p12 = pnand %p480_p11, %p474_p8 }
 0x140   :  { %484 = shalt.err (!%p481_p12)
}
 0x141   :  { %s485_s8 = scalar_lea.hbm %s656_s5, 16 }
 0x142   :  { %p486_p13 = scmp.ne.s32.totalorder %s656_s5, %s485_s8  ;;  %p489_p0 = scmp.lt.u32.totalorder %s485_s8, %s656_s5 }
 0x144   :  { %p491_p1 = pnand %p489_p0, %p486_p13 }
 0x146   :  { %494 = shalt.err (!%p491_p1)
}
 0x147   :  { %366 = dma.vmem_to_hbm [thread:$0]  %s364_s20, 16, %s656_s5, [#allocation5]  }
 0x148   :  { %495 = dma.done.wait [#allocation3], 16  }
 0x149   :  { %496 = vsyncadd [#allocation3], 4294967280 }
 0x14a   :  { %497 = dma.done.wait [#allocation5], 16  }
 0x14b   :  { %498 = vsyncadd [#allocation5], 4294967280 }
 0x14c   :  { %373 = vsyncpa [#allocation3], 1 }
 0x14d   :  { %374 = vsyncpa [#allocation5], 1 }

</bundles_post_ra>
